<compile_context>
chip_gen: v7x
topology: tpu7x:2x2x1
jax: 0.10.0
libtpu: 0.0.40
codegen_flags: <defaults>
</compile_context>

<pallas_src>
import jax
import jax.numpy as jnp
from jax.experimental import pallas as pl
from jax.experimental.pallas import tpu as pltpu


def _round_up(x, m):
    return (x + m - 1) // m * m


def _chip_profile():
    """Generation-specific tile / VMEM budgets."""
    try:
        kind = jax.devices()[0].device_kind.lower()
    except Exception:
        kind = ""
    if "v7" in kind:
        # 64 MiB VMEM per TensorCore, 2 TCs/chip.
        return dict(name="v7x", tm=512, tf=256, row_align=256,
                    vmem_cap=52 * 1024 * 1024, cores=2, slim_io=True)
    if "v6" in kind:
        # 128 MiB VMEM; big row tiles cross the ~670 FLOP/byte weight roofline.
        return dict(name="v6e", tm=1024, tf=512, row_align=256,
                    vmem_cap=100 * 1024 * 1024, cores=1, slim_io=False)
    if "v5" in kind or "v4" in kind:
        # ~240 FLOP/byte roofline; 128-aligned tiles (MXU is 4x128x128).
        return dict(name="v5e", tm=512, tf=512, row_align=128,
                    vmem_cap=96 * 1024 * 1024, cores=1, slim_io=False)
    # Unknown chip: conservative.
    return dict(name="unknown", tm=512, tf=256, row_align=128,
                vmem_cap=48 * 1024 * 1024, cores=1, slim_io=False)


def gated_ffn_kernel(x_ref, w1a_ref, b1a_ref, w1b_ref, b1b_ref, w2_ref, b2_ref,
                     o_ref, acc_ref):
    # x_ref:   (tm, d_model)
    # w1a_ref: (d_model, tf)   b1a_ref: (1, tf)     -- GLU value half
    # w1b_ref: (d_model, tf)   b1b_ref: (1, tf)     -- GLU gate half
    # w2_ref:  (tf, d_model)   b2_ref:  (1, d_model)
    # o_ref:   (tm, d_model)   acc_ref: (tm, d_model) f32 scratch
    k = pl.program_id(1)

    @pl.when(k == 0)
    def _():
        acc_ref[...] = jnp.zeros_like(acc_ref)

    x = x_ref[...]  # native dtype straight to the MXU

    # GLU as two separate dots (no wide intermediate + in-kernel slicing).
    a = jnp.dot(x, w1a_ref[...], preferred_element_type=jnp.float32)
    b = jnp.dot(x, w1b_ref[...], preferred_element_type=jnp.float32)
    a = a + b1a_ref[...].astype(jnp.float32)
    b = b + b1b_ref[...].astype(jnp.float32)
    g = a * jax.nn.sigmoid(b)

    # TODO(synk): dropout implemented as identity (eval mode); training-mode dropout
    # would use pltpu.prng_seed / pltpu.prng_random_bits for the keep mask.

    # Partial second matmul over this d_ff block, accumulated in f32.
    acc_ref[...] += jnp.dot(g.astype(w2_ref.dtype), w2_ref[...],
                            preferred_element_type=jnp.float32)

    @pl.when(k == pl.num_programs(1) - 1)
    def _():
        o_ref[...] = (acc_ref[...] + b2_ref[...].astype(jnp.float32)).astype(o_ref.dtype)


def prepare_params(w1, b1, w2, b2):
    """Split the packed GLU weight / bias ONCE (at load time, not per forward) and
    zero-pad d_ff to a lane-aligned multiple of 128 so any tf tile divides it.

    Padded GLU value columns (w1a, b1a) are zero -> g = 0 there regardless of the gate,
    and the matching zero rows of W2 contribute nothing, so numerics are unchanged.
    """
    d_model, two_dff = w1.shape
    assert two_dff % 2 == 0
    d_ff = two_dff // 2
    assert w2.shape == (d_ff, d_model)

    d_ffp = _round_up(d_ff, 128)
    pad = d_ffp - d_ff

    w1a, w1b = w1[:, :d_ff], w1[:, d_ff:]
    b1a = b1[:d_ff].reshape(1, d_ff)
    b1b = b1[d_ff:].reshape(1, d_ff)
    if pad:
        w1a = jnp.pad(w1a, ((0, 0), (0, pad)))
        w1b = jnp.pad(w1b, ((0, 0), (0, pad)))
        b1a = jnp.pad(b1a, ((0, 0), (0, pad)))
        b1b = jnp.pad(b1b, ((0, 0), (0, pad)))
        w2 = jnp.pad(w2, ((0, pad), (0, 0)))
    b2_2d = b2.reshape(1, d_model)
    return (w1a, b1a, w1b, b1b, w2, b2_2d)


def _pick_tf(d_ffp, tf_target):
    # d_ffp is a multiple of 128, so at worst 128 divides it.
    for cand in (tf_target, 512, 384, 256, 128):
        if cand <= d_ffp and d_ffp % cand == 0:
            return cand
    return d_ffp


def _derive_vmem_limit(tm, tf, d_model, x_dtype, w_dtype, out_dtype,
                       io_buffers, weight_buffers, cap):
    bx = jnp.dtype(x_dtype).itemsize
    bw = jnp.dtype(w_dtype).itemsize
    bo = jnp.dtype(out_dtype).itemsize
    fp = 0
    fp += io_buffers * tm * d_model * bx                    # x tiles
    fp += io_buffers * tm * d_model * bo                    # out tiles
    fp += tm * d_model * 4                                  # f32 accumulator scratch
    fp += weight_buffers * 2 * d_model * tf * bw            # w1a + w1b column blocks
    fp += weight_buffers * tf * d_model * bw                # w2 row block
    fp += weight_buffers * 2 * tf * bw + 2 * d_model * bo   # biases (tiny)
    fp = int(fp * 1.25) + (2 << 20)                         # compiler-scratch headroom
    return max(16 << 20, min(fp, cap))


def gated_feed_forward(x, params, *, tm=None, tf=None, vmem_limit_bytes=None,
                       weight_buffers=2, slim_io_buffers=None):
    """x: (B, S, d_model); params: output of prepare_params()."""
    w1a, b1a, w1b, b1b, w2, b2_2d = params
    B, S, d_model = x.shape
    d_ffp = w1a.shape[1]
    assert w1a.shape == (d_model, d_ffp) and w1b.shape == (d_model, d_ffp)
    assert w2.shape == (d_ffp, d_model)

    prof = _chip_profile()
    tm = prof["tm"] if tm is None else tm
    tf = prof["tf"] if tf is None else tf
    if slim_io_buffers is None:
        slim_io_buffers = prof["slim_io"]
    row_align = prof["row_align"]

    x2 = x.reshape(B * S, d_model)
    N = B * S

    # Row tile: large + MXU-aligned when the problem allows, minimally padded otherwise.
    if N >= row_align:
        tm_eff = min(tm, _round_up(N, row_align))
    else:
        tm_eff = _round_up(N, 8)
    # v7x megacore: keep at least two row tiles so both TensorCores get work.
    if prof["cores"] >= 2 and N >= 2 * row_align:
        tm_eff = min(tm_eff, _round_up((N + 1) // 2, row_align))

    Np = _round_up(N, tm_eff)
    if Np != N:
        x2 = jnp.pad(x2, ((0, Np - N), (0, 0)))

    tf_eff = _pick_tf(d_ffp, tf)
    grid = (Np // tm_eff, d_ffp // tf_eff)

    io_buffers = 1 if slim_io_buffers else 2
    if vmem_limit_bytes is None:
        vmem_limit_bytes = _derive_vmem_limit(
            tm_eff, tf_eff, d_model, x2.dtype, w2.dtype, x.dtype,
            io_buffers, max(2, weight_buffers), prof["vmem_cap"])

    io_mode = {}
    w_mode = {}
    if hasattr(pl, "Buffered"):
        if slim_io_buffers:
            # x / out block index is constant across the inner k axis, so double-buffering
            # them only hides one tm x d_model DMA per whole k sweep; single-buffer to
            # reclaim VMEM (v7x: 64 MiB per TC).
            io_mode = dict(pipeline_mode=pl.Buffered(1))
        if weight_buffers != 2:
            # Deeper weight prefetch (e.g. 3 on v6e/v5e) if profiling shows exposed DMA.
            w_mode = dict(pipeline_mode=pl.Buffered(weight_buffers))

    out = pl.pallas_call(
        gated_ffn_kernel,
        out_shape=jax.ShapeDtypeStruct((Np, d_model), x.dtype),
        grid_spec=pltpu.PrefetchScalarGridSpec(
            num_scalar_prefetch=0,
            grid=grid,
            in_specs=[
                pl.BlockSpec((tm_eff, d_model), lambda i, k: (i, 0), **io_mode),  # x rows
                pl.BlockSpec((d_model, tf_eff), lambda i, k: (0, k), **w_mode),   # W1 value
                pl.BlockSpec((1, tf_eff), lambda i, k: (0, k)),                   # b1 value
                pl.BlockSpec((d_model, tf_eff), lambda i, k: (0, k), **w_mode),   # W1 gate
                pl.BlockSpec((1, tf_eff), lambda i, k: (0, k)),                   # b1 gate
                pl.BlockSpec((tf_eff, d_model), lambda i, k: (k, 0), **w_mode),   # W2 rows
                pl.BlockSpec((1, d_model), lambda i, k: (0, 0)),                  # b2
            ],
            out_specs=pl.BlockSpec((tm_eff, d_model), lambda i, k: (i, 0), **io_mode),
            scratch_shapes=[pltpu.VMEM((tm_eff, d_model), jnp.float32)],
        ),
        compiler_params=pltpu.CompilerParams(
            dimension_semantics=("parallel", "arbitrary"),
            vmem_limit_bytes=int(vmem_limit_bytes),
        ),
    )(x2, w1a, b1a, w1b, b1b, w2, b2_2d)

    if Np != N:
        out = out[:N]
    return out.reshape(B, S, d_model)


def gated_feed_forward_packed(x, w1, b1, w2, b2, **kw):
    # Convenience wrapper. Prefer calling prepare_params() once at parameter-load time:
    # doing the split here re-materializes a weight-sized HBM copy on every forward.
    return gated_feed_forward(x, prepare_params(w1, b1, w2, b2), **kw)


def init_params(key, d_model, d_ff, dtype=jnp.float32):
    # Deterministic synthetic init mirroring nn.Linear's uniform(-1/sqrt(fan_in), 1/sqrt(fan_in))
    k1, k2, k3, k4 = jax.random.split(key, 4)
    lim1 = 1.0 / (d_model ** 0.5)
    lim2 = 1.0 / (d_ff ** 0.5)
    w1 = jax.random.uniform(k1, (d_model, 2 * d_ff), dtype, -lim1, lim1)
    b1 = jax.random.uniform(k2, (2 * d_ff,), dtype, -lim1, lim1)
    w2 = jax.random.uniform(k3, (d_ff, d_model), dtype, -lim2, lim2)
    b2 = jax.random.uniform(k4, (d_model,), dtype, -lim2, lim2)
    return w1, b1, w2, b2


def reference(x, w1, b1, w2, b2):
    h = x @ w1 + b1
    d_ff = w2.shape[0]
    g = h[..., :d_ff] * jax.nn.sigmoid(h[..., d_ff:])
    return g @ w2 + b2


if __name__ == "__main__":
    key = jax.random.PRNGKey(0)
    B, S, d_model, d_ff = 2, 8, 32, 64

    kx, kp = jax.random.split(key)
    x = jax.random.normal(kx, (B, S, d_model), jnp.float32)
    w1, b1, w2, b2 = init_params(kp, d_model, d_ff)

    params = prepare_params(w1, b1, w2, b2)   # hoisted weight split (one-time)
    y = gated_feed_forward(x, params)
    y = jax.block_until_ready(y)

    y_ref = reference(x, w1, b1, w2, b2)
    assert y.shape == (B, S, d_model)
    assert jnp.allclose(y, y_ref, atol=1e-5, rtol=1e-5), "mismatch vs reference"

    print("KERNEL_OK")
</pallas_src>

<mosaic_0001>
module attributes {stable_mosaic.version = 11 : i64} {
  func.func @gated_ffn_kernel(%arg0: i32, %arg1: i32, %arg2: memref<16x32xf32, #tpu.memory_space<vmem>>, %arg3: memref<32x128xf32, #tpu.memory_space<vmem>>, %arg4: memref<1x128xf32, #tpu.memory_space<vmem>>, %arg5: memref<32x128xf32, #tpu.memory_space<vmem>>, %arg6: memref<1x128xf32, #tpu.memory_space<vmem>>, %arg7: memref<128x32xf32, #tpu.memory_space<vmem>>, %arg8: memref<1x32xf32, #tpu.memory_space<vmem>>, %arg9: memref<16x32xf32, #tpu.memory_space<vmem>>, %arg10: memref<16x32xf32, #tpu.memory_space<vmem>>) attributes {dimension_semantics = [#tpu.dimension_semantics<parallel>, #tpu.dimension_semantics<arbitrary>], iteration_bounds = array<i64: 1, 1>, scalar_prefetch = 0 : i64, scratch_operands = 1 : i64, tpu.core_type = #tpu.core_type<tc>, window_params = [{transform_indices = @transform_0, window_bounds = array<i64: 16, 32>}, {transform_indices = @transform_1, window_bounds = array<i64: 32, 128>}, {transform_indices = @transform_2, window_bounds = array<i64: 1, 128>}, {transform_indices = @transform_3, window_bounds = array<i64: 32, 128>}, {transform_indices = @transform_4, window_bounds = array<i64: 1, 128>}, {transform_indices = @transform_5, window_bounds = array<i64: 128, 32>}, {pipeline_mode = #tpu.pipeline_mode<synchronous>, transform_indices = @transform_6, window_bounds = array<i64: 1, 32>}, {transform_indices = @transform_7, window_bounds = array<i64: 16, 32>}]} {
    %c0_i32 = arith.constant 0 : i32
    %0 = arith.cmpi eq, %arg1, %c0_i32 : i32
    %1 = arith.extui %0 : i1 to i32
    %c0_i32_0 = arith.constant 0 : i32
    %2 = arith.cmpi ne, %1, %c0_i32_0 : i32
    scf.if %2 {
      %cst_21 = arith.constant 0.000000e+00 : f32
      %28 = vector.broadcast %cst_21 : f32 to vector<16x32xf32>
      %c0_22 = arith.constant 0 : index
      %c0_23 = arith.constant 0 : index
      %29 = vector.load %arg10[%c0_22, %c0_23] : memref<16x32xf32, #tpu.memory_space<vmem>>, vector<16x32xf32>
      tpu.vector_store %arg10[%c0_22, %c0_23], %28 {strides = array<i32>} : memref<16x32xf32, #tpu.memory_space<vmem>>, vector<16x32xf32>,
    } else {
    }
    %c0 = arith.constant 0 : index
    %c0_1 = arith.constant 0 : index
    %3 = vector.load %arg2[%c0, %c0_1] : memref<16x32xf32, #tpu.memory_space<vmem>>, vector<16x32xf32>
    %c0_2 = arith.constant 0 : index
    %c0_3 = arith.constant 0 : index
    %4 = vector.load %arg3[%c0_2, %c0_3] : memref<32x128xf32, #tpu.memory_space<vmem>>, vector<32x128xf32>
    %cst = arith.constant dense<0.000000e+00> : vector<16x128xf32>
    %5 = tpu.matmul %3, %4, %cst {dimension_numbers = #tpu.dot_dimension_numbers<[1], [0], [0], [1], [0, 0, 1, 1], [], []>} : vector<16x32xf32>, vector<32x128xf32>, vector<16x128xf32> -> vector<16x128xf32>
    %c0_4 = arith.constant 0 : index
    %c0_5 = arith.constant 0 : index
    %6 = vector.load %arg5[%c0_4, %c0_5] : memref<32x128xf32, #tpu.memory_space<vmem>>, vector<32x128xf32>
    %cst_6 = arith.constant dense<0.000000e+00> : vector<16x128xf32>
    %7 = tpu.matmul %3, %6, %cst_6 {dimension_numbers = #tpu.dot_dimension_numbers<[1], [0], [0], [1], [0, 0, 1, 1], [], []>} : vector<16x32xf32>, vector<32x128xf32>, vector<16x128xf32> -> vector<16x128xf32>
    %c0_7 = arith.constant 0 : index
    %c0_8 = arith.constant 0 : index
    %8 = vector.load %arg4[%c0_7, %c0_8] : memref<1x128xf32, #tpu.memory_space<vmem>>, vector<1x128xf32>
    %9 = vector.broadcast %8 : vector<1x128xf32> to vector<16x128xf32>
    %10 = arith.addf %5, %9 : vector<16x128xf32>
    %c0_9 = arith.constant 0 : index
    %c0_10 = arith.constant 0 : index
    %11 = vector.load %arg6[%c0_9, %c0_10] : memref<1x128xf32, #tpu.memory_space<vmem>>, vector<1x128xf32>
    %12 = vector.broadcast %11 : vector<1x128xf32> to vector<16x128xf32>
    %13 = arith.addf %7, %12 : vector<16x128xf32>
    %14 = arith.negf %13 : vector<16x128xf32>
    %15 = math.exp %14 : vector<16x128xf32>
    %cst_11 = arith.constant 1.000000e+00 : f32
    %16 = vector.broadcast %cst_11 : f32 to vector<16x128xf32>
    %17 = arith.addf %16, %15 : vector<16x128xf32>
    %18 = arith.divf %16, %17 : vector<16x128xf32>
    %19 = arith.mulf %10, %18 : vector<16x128xf32>
    %c0_12 = arith.constant 0 : index
    %c0_13 = arith.constant 0 : index
    %20 = vector.load %arg10[%c0_12, %c0_13] : memref<16x32xf32, #tpu.memory_space<vmem>>, vector<16x32xf32>
    %c0_14 = arith.constant 0 : index
    %c0_15 = arith.constant 0 : index
    %21 = vector.load %arg7[%c0_14, %c0_15] : memref<128x32xf32, #tpu.memory_space<vmem>>, vector<128x32xf32>
    %cst_16 = arith.constant dense<0.000000e+00> : vector<16x32xf32>
    %22 = tpu.matmul %19, %21, %cst_16 {dimension_numbers = #tpu.dot_dimension_numbers<[1], [0], [0], [1], [0, 0, 1, 1], [], []>} : vector<16x128xf32>, vector<128x32xf32>, vector<16x32xf32> -> vector<16x32xf32>
    %23 = arith.addf %20, %22 : vector<16x32xf32>
    %c0_17 = arith.constant 0 : index
    %c0_18 = arith.constant 0 : index
    %24 = vector.load %arg10[%c0_17, %c0_18] : memref<16x32xf32, #tpu.memory_space<vmem>>, vector<16x32xf32>
    tpu.vector_store %arg10[%c0_17, %c0_18], %23 {strides = array<i32>} : memref<16x32xf32, #tpu.memory_space<vmem>>, vector<16x32xf32>,
    %c0_i32_19 = arith.constant 0 : i32
    %25 = arith.cmpi eq, %arg1, %c0_i32_19 : i32
    %26 = arith.extui %25 : i1 to i32
    %c0_i32_20 = arith.constant 0 : i32
    %27 = arith.cmpi ne, %26, %c0_i32_20 : i32
    scf.if %27 {
      %c0_21 = arith.constant 0 : index
      %c0_22 = arith.constant 0 : index
      %28 = vector.load %arg10[%c0_21, %c0_22] : memref<16x32xf32, #tpu.memory_space<vmem>>, vector<16x32xf32>
      %c0_23 = arith.constant 0 : index
      %c0_24 = arith.constant 0 : index
      %29 = vector.load %arg8[%c0_23, %c0_24] : memref<1x32xf32, #tpu.memory_space<vmem>>, vector<1x32xf32>
      %30 = vector.broadcast %29 : vector<1x32xf32> to vector<16x32xf32>
      %31 = arith.addf %28, %30 : vector<16x32xf32>
      %c0_25 = arith.constant 0 : index
      %c0_26 = arith.constant 0 : index
      %32 = vector.load %arg9[%c0_25, %c0_26] : memref<16x32xf32, #tpu.memory_space<vmem>>, vector<16x32xf32>
      tpu.vector_store %arg9[%c0_25, %c0_26], %31 {strides = array<i32>} : memref<16x32xf32, #tpu.memory_space<vmem>>, vector<16x32xf32>,
    } else {
    }
    return
  }
  func.func @transform_0(%arg0: i32, %arg1: i32) -> (i32, i32) {
    %c0_i32 = arith.constant 0 : i32
    %c0_i32_0 = arith.constant 0 : i32
    return %arg0, %c0_i32 : i32, i32
  }
  func.func @transform_1(%arg0: i32, %arg1: i32) -> (i32, i32) {
    %c0_i32 = arith.constant 0 : i32
    %c0_i32_0 = arith.constant 0 : i32
    return %c0_i32, %arg1 : i32, i32
  }
  func.func @transform_2(%arg0: i32, %arg1: i32) -> (i32, i32) {
    %c0_i32 = arith.constant 0 : i32
    %c0_i32_0 = arith.constant 0 : i32
    return %c0_i32, %arg1 : i32, i32
  }
  func.func @transform_3(%arg0: i32, %arg1: i32) -> (i32, i32) {
    %c0_i32 = arith.constant 0 : i32
    %c0_i32_0 = arith.constant 0 : i32
    return %c0_i32, %arg1 : i32, i32
  }
  func.func @transform_4(%arg0: i32, %arg1: i32) -> (i32, i32) {
    %c0_i32 = arith.constant 0 : i32
    %c0_i32_0 = arith.constant 0 : i32
    return %c0_i32, %arg1 : i32, i32
  }
  func.func @transform_5(%arg0: i32, %arg1: i32) -> (i32, i32) {
    %c0_i32 = arith.constant 0 : i32
    %c0_i32_0 = arith.constant 0 : i32
    return %arg1, %c0_i32 : i32, i32
  }
  func.func @transform_6(%arg0: i32, %arg1: i32) -> (i32, i32) {
    %c0_i32 = arith.constant 0 : i32
    %c0_i32_0 = arith.constant 0 : i32
    %c0_i32_1 = arith.constant 0 : i32
    return %c0_i32, %c0_i32_0 : i32, i32
  }
  func.func @transform_7(%arg0: i32, %arg1: i32) -> (i32, i32) {
    %c0_i32 = arith.constant 0 : i32
    %c0_i32_0 = arith.constant 0 : i32
    return %arg0, %c0_i32 : i32, i32
  }
}

</mosaic_0001>

<bundles_post_ra>
// kernel: tpu_custom_call.1
= control target key start
LH: loop header
LB: loop body
LE: loop exit
PB: predicated region body
PF: predicated region fallthrough
CT: control target
= control target key end

     0   :  { %vm31_vm0 = vcmask 261120   ;;  %s691_s0 = inlined_call_operand.vmem [shape: f32[16,32], index: 0, kind: input, shape index: {}]   ;;  %s692_s1 = inlined_call_operand.vmem [shape: f32[32,128], index: 1, kind: input, shape index: {}]   ;;  %s693_s2 = inlined_call_operand.vmem [shape: f32[1,128], index: 2, kind: input, shape index: {}]   ;;  %s694_s3 = inlined_call_operand.vmem [shape: f32[32,128], index: 3, kind: input, shape index: {}]   ;;  %s695_s4 = inlined_call_operand.vmem [shape: f32[1,128], index: 4, kind: input, shape index: {}]   ;;  %s696_s5 = inlined_call_operand.vmem [shape: f32[128,32], index: 5, kind: input, shape index: {}]   ;;  %s697_s6 = inlined_call_operand.vmem [shape: f32[1,32], index: 6, kind: input, shape index: {}]   ;;  %s698_s7 = inlined_call_operand.hbm [shape: f32[16,32], index: 7, kind: output, shape index: {}]  }
   0x1   :  { %v36_v0 = vld [vmem:[%s692_s1] sm:$0xff]  ;;  %v37_v1 = vld [vmem:[%s692_s1 + $0x8] sm:$0xff]  ;;  %v38_v2 = vld [vmem:[%s692_s1 + $0x10] sm:$0xff] }
   0x2   :  { %v454_v3 = vpack.c.bf16 %v37_v1, %v36_v0  ;;  %v39_v4 = vld [vmem:[%s692_s1 + $0x18] sm:$0xff]  ;;  %v34_v5 = vld [vmem:[%s691_s0] sm:$0xff]  ;;  %v41_v8 = vld [vmem:[%s694_s3 + $0x8] sm:$0xff] }
   0x3   :  { %v458_v6 = vpack.c.bf16 %v39_v4, %v38_v2  ;;  %405 = vmatprep.mubr.msk.f32.mxu1 %vm31_vm0, %v34_v5  ;;  %v40_v7 = vld [vmem:[%s694_s3] sm:$0xff] }
   0x4   :  { %455 = vmatprep.subr.bf16.mxu1 %v454_v3 }
   0x5   :  { %12 = vsyncpa [#allocation4], 0  ;;  %457 = vmatpush3.bf16.msra.mxu1 %v454_v3  ;;  %v462_v9 = vpack.c.bf16 %v41_v8, %v40_v7  ;;  %v42_v10 = vld [vmem:[%s694_s3 + $0x10] sm:$0xff]  ;;  %v43_v11 = vld [vmem:[%s694_s3 + $0x18] sm:$0xff]  ;;  %v538_v38 = vmov 0.0   ;;  %s539_s27 = smov [#allocation3]  }
   0x6   :  { %459 = vmatprep.subr.bf16.mxu1 %v458_v6  ;;  %v35_v12 = vld [vmem:[%s691_s0 + $0x8] sm:$0xff]  ;;  %v466_v13 = vpack.c.bf16 %v43_v11, %v42_v10  ;;  %v231_v14 = vld [vmem:[%s696_s5] sm:$0xff]  ;;  %v233_v17 = vld [vmem:[%s696_s5 + $0x10] sm:$0xff]  ;;  %33 = vst.msk [vmem:[#allocation2 + $0x8] sm:$0xff] %vm31_vm0, %v538_v38  ;;  %s347_s28 = sshll.u32 %s539_s27, 4  ;;  %s348_s28 = int_to_ptr.vmem [resolvable:$true] %s347_s28 }
   0x7   :  { %v232_v15 = vld [vmem:[%s696_s5 + $0x8] sm:$0xff]  ;;  %v234_v18 = vld [vmem:[%s696_s5 + $0x18] sm:$0xff]  ;;  %v235_v20 = vld [vmem:[%s696_s5 + $0x20] sm:$0xff]  ;;  %32 = vst.msk [vmem:[#allocation2] sm:$0xff] %vm31_vm0, %v538_v38  ;;  %s514_s29 = scalar_lea.vmem %s348_s28, 256  ;;  %p519_p1 = scmp.lt.s32.totalorder %s348_s28, %s348_s28 }
   0x8   :  { %v470_v16 = vpack.c.bf16 %v232_v15, %v231_v14  ;;  %v474_v19 = vpack.c.bf16 %v234_v18, %v233_v17  ;;  %v236_v21 = vld [vmem:[%s696_s5 + $0x28] sm:$0xff]  ;;  %v237_v23 = vld [vmem:[%s696_s5 + $0x30] sm:$0xff]  ;;  %v238_v24 = vld [vmem:[%s696_s5 + $0x38] sm:$0xff]  ;;  %p515_p0 = scmp.ne.s32.totalorder %s348_s28, %s514_s29  ;;  %p520_p2 = scmp.lt.s32.totalorder %s514_s29, %s514_s29 }
   0x9   :  { %461 = vmatpush3.bf16.msra.mxu1 %v458_v6  ;;  %v478_v22 = vpack.c.bf16 %v236_v21, %v235_v20  ;;  %v482_v25 = vpack.c.bf16 %v238_v24, %v237_v23  ;;  %v239_v26 = vld [vmem:[%s696_s5 + $0x40] sm:$0xff]  ;;  %v240_v27 = vld [vmem:[%s696_s5 + $0x48] sm:$0xff]  ;;  %v241_v29 = vld [vmem:[%s696_s5 + $0x50] sm:$0xff] }
   0xa   :  { %463 = vmatprep.subr.bf16.mxu1 %v462_v9  ;;  %471 = vmatprep.subr.bf16.mxu0 %v470_v16  ;;  %v486_v28 = vpack.c.bf16 %v240_v27, %v239_v26  ;;  %v242_v30 = vld [vmem:[%s696_s5 + $0x58] sm:$0xff]  ;;  %v243_v32 = vld [vmem:[%s696_s5 + $0x60] sm:$0xff]  ;;  %v244_v33 = vld [vmem:[%s696_s5 + $0x68] sm:$0xff]  ;;  %p521_p3 = por %p520_p2, %p519_p1 }
   0xb   :  { %473 = vmatpush3.bf16.msra.mxu0 %v470_v16  ;;  %v490_v31 = vpack.c.bf16 %v242_v30, %v241_v29  ;;  %v494_v34 = vpack.c.bf16 %v244_v33, %v243_v32  ;;  %v245_v35 = vld [vmem:[%s696_s5 + $0x70] sm:$0xff]  ;;  %v246_v36 = vld [vmem:[%s696_s5 + $0x78] sm:$0xff]  ;;  %v361_v41 = vld [vmem:[%s695_s4] ss:$0 sm:$0xff] }
   0xc   :  { %406 = vmatmul.mubr.msk.f32.vlgmr.msra.gmra.mrb[0].mxu1 %vm31_vm0, %v35_v12  ;;  %475 = vmatprep.subr.bf16.mxu0 %v474_v19  ;;  %v498_v37 = vpack.c.bf16 %v246_v36, %v245_v35  ;;  %v358_v52 = vld [vmem:[%s693_s2] ss:$0 sm:$0xff]  ;;  %p522_p4 = pnand %p521_p3, %p515_p0 }
   0xd   :  { %465 = vmatpush3.bf16.msra.mxu1 %v462_v9  ;;  %416 = vmatprep.mubr.msk.f32.mxu1 %vm31_vm0, %v34_v5  ;;  %v230_v59 = vld [vmem:[#allocation2 + $0x8] sm:$0xff]  ;;  %v366_v1 = vld [vmem:[%s697_s6] ss:$0 sm:$0xff] }
   0xe   :  { %467 = vmatprep.subr.bf16.mxu1 %v466_v13  ;;  %v229_v60 = vld [vmem:[#allocation2] sm:$0xff] }
   0xf   :  { %477 = vmatpush3.bf16.msra.mxu0 %v474_v19 }
  0x10   :  { %479 = vmatprep.subr.bf16.mxu0 %v478_v22 }
  0x11   :  { %469 = vmatpush3.bf16.msra.mxu1 %v466_v13 }
  0x13   :  { %481 = vmatpush3.bf16.msra.mxu0 %v478_v22 }
  0x14   :  { %417 = vmatmul.mubr.msk.f32.vlgmr.msra.gmra.mrb[2].mxu1 %vm31_vm0, %v35_v12  ;;  %483 = vmatprep.subr.bf16.mxu0 %v482_v25 }
  0x17   :  { %485 = vmatpush3.bf16.msra.mxu0 %v482_v25 }
  0x18   :  { %487 = vmatprep.subr.bf16.mxu0 %v486_v28 }
  0x1b   :  { %489 = vmatpush3.bf16.msra.mxu0 %v486_v28 }
  0x1c   :  { %491 = vmatprep.subr.bf16.mxu0 %v490_v31 }
  0x1f   :  { %493 = vmatpush3.bf16.msra.mxu0 %v490_v31 }
  0x20   :  { %495 = vmatprep.subr.bf16.mxu0 %v494_v34 }
  0x23   :  { %497 = vmatpush3.bf16.msra.mxu0 %v494_v34 }
  0x24   :  { %499 = vmatprep.subr.bf16.mxu0 %v498_v37 }
  0x27   :  { %501 = vmatpush3.bf16.msra.mxu0 %v498_v37 }
  0xdf   :  { %v407_v39 = vpop.f32.mrb[0].mxu1 }
  0xe0   :  { %v124_v40 = vpop.f32.mrb[1].mxu1  ;;  %v130_v53 = vadd.f32 %v407_v39, %v358_v52 }
  0xe1   :  { %v125_v55 = vadd.f32 %v358_v52, %v124_v40 }
  0xe7   :  { %v418_v42 = vpop.f32.mrb[2].mxu1 }
  0xe8   :  { %v212_v43 = vadd.f32 %v418_v42, %v361_v41  ;;  %v206_v44 = vpop.f32.mrb[3].mxu1 }
  0xe9   :  { %v207_v45 = vadd.f32 %v361_v41, %v206_v44 }
  0xea   :  { %v365_v46 = vmul.f32 -1.442695, %v212_v43 }
  0xeb   :  { %v364_v47 = vmul.f32 -1.442695, %v207_v45 }
  0xec   :  { %506 = vpow2.f32 %v365_v46 }
  0xed   :  { %508 = vpow2.f32 %v364_v47 }
  0xf6   :  { %v507_v48 = vpop.eup %506 }
  0xf7   :  { %v509_v49 = vpop.eup %508  ;;  %v222_v50 = vadd.f32 1.0, %v507_v48 }
  0xf8   :  { %v221_v51 = vadd.f32 1.0, %v509_v49 }
  0xf9   :  { %510 = vrcp.f32 %v222_v50 }
  0xfa   :  { %512 = vrcp.f32 %v221_v51 }
 0x103   :  { %v511_v54 = vpop.eup %510 }
 0x104   :  { %v513_v56 = vpop.eup %512  ;;  %v228_v57 = vmul.f32 %v511_v54, %v130_v53 }
 0x105   :  { %v227_v58 = vmul.f32 %v513_v56, %v125_v55 }
 0x107   :  { %451 = vmatprep.mubr.f32.mxu0 %v227_v58 }
 0x108   :  { %452 = vmatmul.mubr.f32.vlgmr.msra.gmra.mrb[0].mxu0 %v228_v57 }
 0x1db   :  { %v453_v61 = vpop.f32.mrb[0].mxu0 }
 0x1dc   :  { %v323_v62 = vadd.f32 %v453_v61, %v230_v59  ;;  %v313_v63 = vpop.f32.mrb[1].mxu0 }
 0x1dd   :  { %v322_v0 = vadd.f32 %v313_v63, %v229_v60 }
 0x1de   :  { %325 = vst.msk [vmem:[#allocation2 + $0x8] sm:$0xff] %vm31_vm0, %v323_v62 }
 0x1df   :  { %324 = vst.msk [vmem:[#allocation2] sm:$0xff] %vm31_vm0, %v322_v0 }
 0x1e5   :  { %v330_v2 = vld [vmem:[#allocation2 + $0x8] sm:$0xff] }
 0x1e6   :  { %v329_v3 = vld [vmem:[#allocation2] sm:$0xff]  ;;  %v339_v4 = vadd.f32 %v366_v1, %v330_v2 }
 0x1e7   :  { %v338_v5 = vadd.f32 %v366_v1, %v329_v3 }
 0x1e8   :  { %341 = vst.msk [vmem:[#allocation3 + $0x8] sm:$0xff] %vm31_vm0, %v339_v4 }
 0x1e9   :  { %340 = vst.msk [vmem:[#allocation3] sm:$0xff] %vm31_vm0, %v338_v5 }
 0x1ea   :  { %525 = shalt.err (!%p522_p4)
}
 0x1eb   :  { %s526_s8 = scalar_lea.hbm %s698_s7, 256 }
 0x1ec   :  { %p527_p5 = scmp.ne.s32.totalorder %s698_s7, %s526_s8  ;;  %p530_p6 = scmp.lt.u32.totalorder %s526_s8, %s698_s7 }
 0x1ee   :  { %p532_p7 = pnand %p530_p6, %p527_p5 }
 0x1f0   :  { %535 = shalt.err (!%p532_p7)
}
 0x1f1   :  { %s540_s13 = smov 128   ;;  %s541_s14 = smov 8  }
 0x1f2   :  { %353 = dma.vmem_to_hbm [thread:$0]  %s348_s28, 256, %s698_s7, [#allocation4], %s540_s13, %s540_s13, %s541_s14  }
 0x1f3   :  { %536 = dma.done.wait [#allocation4], 256  }
 0x1f4   :  { %537 = vsyncadd [#allocation4], 4294967040 }
 0x1f5   :  { %357 = vsyncpa [#allocation4], 1 }

</bundles_post_ra>
